<compile_context>
chip_gen: v5e
topology: v5e:2x2
jax: 0.10.0
libtpu: 0.0.40
codegen_flags: <defaults>
</compile_context>

<pallas_src>
import math

import jax
import jax.numpy as jnp
from jax import lax
from jax.experimental import pallas as pl
from jax.experimental.pallas import tpu as pltpu

DROP_P = 0.3
DROP_SEED = 1234


# ----------------------------------------------------------------------------
# Encoder: bidirectional masked GRU.  grid = (2,) -> one grid step per
# direction; the time loop runs inside the kernel.  The input projection
# gi = x @ W_ih + b_ih is precomputed outside, so each step is only three
# [B,H] x [H,H] matmuls plus VPU gate math.
# ----------------------------------------------------------------------------
def encoder_gru_kernel(gir_ref, giz_ref, gin_ref, mask_ref,
                       whr_ref, whz_ref, whn_ref,
                       bhr_ref, bhz_ref, bhn_ref,
                       out_ref, hfin_ref):
    d = pl.program_id(0)                     # 0 = forward, 1 = backward
    S, B, H = gir_ref.shape

    whr = whr_ref[...]
    whz = whz_ref[...]
    whn = whn_ref[...]
    bhr = bhr_ref[...]
    bhz = bhz_ref[...]
    bhn = bhn_ref[...]

    def step(t, h):
        tt = jnp.where(d == 0, t, S - 1 - t)   # reversed walk for backward dir
        m = mask_ref[tt]                       # [B,1]; 1.0 where tt < length
        gh_r = jnp.dot(h, whr, preferred_element_type=jnp.float32) + bhr
        gh_z = jnp.dot(h, whz, preferred_element_type=jnp.float32) + bhz
        gh_n = jnp.dot(h, whn, preferred_element_type=jnp.float32) + bhn
        r = jax.nn.sigmoid(gir_ref[tt] + gh_r)
        z = jax.nn.sigmoid(giz_ref[tt] + gh_z)
        n = jnp.tanh(gin_ref[tt] + r * gh_n)
        h_new = (1.0 - z) * n + z * h
        out_ref[tt] = m * h_new                # pad_packed: zero padded steps
        return m * h_new + (1.0 - m) * h       # pack_padded: freeze hidden

    h_fin = lax.fori_loop(0, S, step, jnp.zeros((B, H), jnp.float32))
    hfin_ref[...] = h_fin


def encoder_run(gi_r, gi_z, gi_n, mask_tm, whh_r, whh_z, whh_n,
                bhh_r, bhh_z, bhh_n):
    _, S, B, H = gi_r.shape
    gi_spec = pl.BlockSpec((None, S, B, H), lambda d: (d, 0, 0, 0))
    w_spec = pl.BlockSpec((None, H, H), lambda d: (d, 0, 0))
    b_spec = pl.BlockSpec((None, 1, H), lambda d: (d, 0, 0))
    out, hfin = pl.pallas_call(
        encoder_gru_kernel,
        grid=(2,),
        in_specs=[gi_spec, gi_spec, gi_spec,
                  pl.BlockSpec((S, B, 1), lambda d: (0, 0, 0)),
                  w_spec, w_spec, w_spec, b_spec, b_spec, b_spec],
        out_specs=(pl.BlockSpec((None, S, B, H), lambda d: (d, 0, 0, 0)),
                   pl.BlockSpec((None, B, H), lambda d: (d, 0, 0))),
        out_shape=(jax.ShapeDtypeStruct((2, S, B, H), jnp.float32),
                   jax.ShapeDtypeStruct((2, B, H), jnp.float32)),
        compiler_params=pltpu.CompilerParams(
            dimension_semantics=("parallel",)),
    )(gi_r, gi_z, gi_n, mask_tm, whh_r, whh_z, whh_n, bhh_r, bhh_z, bhh_n)
    return out, hfin


# ----------------------------------------------------------------------------
# Decoder recurrence: GRUCell + terse_attention, whole time loop in-kernel.
# Emits ctx_t and h_t per step; the classifier + dropout are hoisted out.
# ----------------------------------------------------------------------------
def decoder_rnn_kernel(gixr_ref, gixz_ref, gixn_ref, enc_ref, h0_ref,
                       wcr_ref, wcz_ref, wcn_ref,
                       whr_ref, whz_ref, whn_ref,
                       bhr_ref, bhz_ref, bhn_ref,
                       ctx_out_ref, h_out_ref):
    T, B, D = gixr_ref.shape
    enc = enc_ref[...]                                   # [B,S,D]
    wcr = wcr_ref[...]
    wcz = wcz_ref[...]
    wcn = wcn_ref[...]
    whr = whr_ref[...]
    whz = whz_ref[...]
    whn = whn_ref[...]
    bhr = bhr_ref[...]
    bhz = bhz_ref[...]
    bhn = bhn_ref[...]

    def step(t, carry):
        h, ctx = carry
        # GRUCell on [x_t ; ctx]: x_t half of the input projection was
        # precomputed outside; the ctx half is a split-weight matmul here.
        gi_r = gixr_ref[t] + jnp.dot(ctx, wcr, preferred_element_type=jnp.float32)
        gi_z = gixz_ref[t] + jnp.dot(ctx, wcz, preferred_element_type=jnp.float32)
        gi_n = gixn_ref[t] + jnp.dot(ctx, wcn, preferred_element_type=jnp.float32)
        gh_r = jnp.dot(h, whr, preferred_element_type=jnp.float32) + bhr
        gh_z = jnp.dot(h, whz, preferred_element_type=jnp.float32) + bhz
        gh_n = jnp.dot(h, whn, preferred_element_type=jnp.float32) + bhn
        r = jax.nn.sigmoid(gi_r + gh_r)
        z = jax.nn.sigmoid(gi_z + gh_z)
        n = jnp.tanh(gi_n + r * gh_n)
        h_new = (1.0 - z) * n + z * h

        # terse_attention as batched MXU matmuls (query length 1).
        q = h_new[:, None, :]                                         # [B,1,D]
        scores = jnp.einsum('bqd,bsd->bqs', q, enc,
                            preferred_element_type=jnp.float32)       # [B,1,S]
        probs = jax.nn.softmax(scores, axis=-1)
        ctx3 = jnp.einsum('bqs,bsd->bqd', probs, enc,
                          preferred_element_type=jnp.float32)         # [B,1,D]
        ctx_new = ctx3[:, 0, :]

        h_out_ref[t] = h_new
        ctx_out_ref[t] = ctx_new
        return h_new, ctx_new

    lax.fori_loop(0, T, step, (h0_ref[...], jnp.zeros((B, D), jnp.float32)))


def decoder_run(gix_r, gix_z, gix_n, enc_states, h0,
                wc_r, wc_z, wc_n, wh_r, wh_z, wh_n, bh_r, bh_z, bh_n):
    T, B, D = gix_r.shape
    S = enc_states.shape[1]

    def full(shape):
        return pl.BlockSpec(shape, lambda i, _s=shape: (0,) * len(_s))

    ctx_seq, h_seq = pl.pallas_call(
        decoder_rnn_kernel,
        grid=(1,),
        in_specs=[full((T, B, D)), full((T, B, D)), full((T, B, D)),
                  full((B, S, D)), full((B, D)),
                  full((D, D)), full((D, D)), full((D, D)),
                  full((D, D)), full((D, D)), full((D, D)),
                  full((1, D)), full((1, D)), full((1, D))],
        out_specs=(full((T, B, D)), full((T, B, D))),
        out_shape=(jax.ShapeDtypeStruct((T, B, D), jnp.float32),
                   jax.ShapeDtypeStruct((T, B, D), jnp.float32)),
        compiler_params=pltpu.CompilerParams(
            dimension_semantics=("arbitrary",)),
    )(gix_r, gix_z, gix_n, enc_states, h0,
      wc_r, wc_z, wc_n, wh_r, wh_z, wh_n, bh_r, bh_z, bh_n)
    return ctx_seq, h_seq


# ----------------------------------------------------------------------------
# Classifier + dropout, hoisted out of the recurrence: one [T*B,D]x[D,V] pair
# of matmuls (split weights: no [ctx ; h] concatenation).
# ----------------------------------------------------------------------------
def classifier_kernel(ctx_ref, h_ref, kc_ref, kh_ref, wc_ref, wh_ref, b_ref,
                      out_ref):
    ctx = ctx_ref[...] * kc_ref[...]     # pre-scaled inverted-dropout masks
    h = h_ref[...] * kh_ref[...]
    out_ref[...] = (jnp.dot(ctx, wc_ref[...], preferred_element_type=jnp.float32)
                    + jnp.dot(h, wh_ref[...], preferred_element_type=jnp.float32)
                    + b_ref[...])


def classifier_run(ctx_n, h_n, keep_c, keep_h, wc, wh, b):
    N, D = ctx_n.shape
    V = wc.shape[1]

    def full(shape):
        return pl.BlockSpec(shape, lambda i, _s=shape: (0,) * len(_s))

    return pl.pallas_call(
        classifier_kernel,
        grid=(1,),
        in_specs=[full((N, D)), full((N, D)), full((N, D)), full((N, D)),
                  full((D, V)), full((D, V)), full((1, V))],
        out_specs=full((N, V)),
        out_shape=jax.ShapeDtypeStruct((N, V), jnp.float32),
        compiler_params=pltpu.CompilerParams(
            dimension_semantics=("arbitrary",)),
    )(ctx_n, h_n, keep_c, keep_h, wc, wh, b)


# ----------------------------------------------------------------------------
# Full TextNMTModel forward
# ----------------------------------------------------------------------------
def text_nmt_forward(params, source_sequence, source_lengths, target_sequence,
                     drop_seed=DROP_SEED):
    H = params["enc_whh"].shape[1]
    D = 2 * H

    # ---------------- encoder ----------------
    src_emb = jnp.take(params["src_emb"], source_sequence, axis=0)   # [B,S,E]
    B, S, _ = src_emb.shape
    x_tm = jnp.transpose(src_emb, (1, 0, 2))                         # [S,B,E]
    t_idx = jnp.arange(S, dtype=jnp.int32)[:, None]
    mask_tm = (t_idx < source_lengths[None, :].astype(jnp.int32)
               ).astype(jnp.float32)[:, :, None]                     # [S,B,1]

    # Hoisted input projection (one big matmul for both directions / all steps)
    gi_all = (jnp.einsum('sbe,dez->dsbz', x_tm, params["enc_wih"],
                         preferred_element_type=jnp.float32)
              + params["enc_bih"][:, None, None, :])                 # [2,S,B,3H]
    gi_r, gi_z, gi_n = gi_all[..., :H], gi_all[..., H:2 * H], gi_all[..., 2 * H:]
    whh = params["enc_whh"]                                          # [2,H,3H]
    whh_r, whh_z, whh_n = whh[..., :H], whh[..., H:2 * H], whh[..., 2 * H:]
    bhh = params["enc_bhh"][:, None, :]                              # [2,1,3H]
    bhh_r, bhh_z, bhh_n = bhh[..., :H], bhh[..., H:2 * H], bhh[..., 2 * H:]

    out_stk, hfin_stk = encoder_run(gi_r, gi_z, gi_n, mask_tm,
                                    whh_r, whh_z, whh_n, bhh_r, bhh_z, bhh_n)

    # TODO(synk): pad_packed_sequence truncates to max(lengths); we assume
    # max(source_lengths) == seq_len so shapes match exactly.
    encoder_states = jnp.transpose(
        jnp.concatenate([out_stk[0], out_stk[1]], axis=-1), (1, 0, 2))   # [B,S,2H]
    encoder_output = jnp.concatenate([hfin_stk[0], hfin_stk[1]], axis=-1)  # [B,2H]

    # ---------------- decoder ----------------
    tgt_emb = jnp.take(params["tgt_emb"], target_sequence, axis=0)   # [B,T,Et]
    T = tgt_emb.shape[1]
    tgt_tm = jnp.transpose(tgt_emb, (1, 0, 2))                       # [T,B,Et]
    Et = tgt_tm.shape[-1]

    wih = params["dec_wih"]                                          # [Et+D,3D]
    gix_all = (jnp.einsum('tbe,ez->tbz', tgt_tm, wih[:Et],
                          preferred_element_type=jnp.float32)
               + params["dec_bih"][None, None, :])                   # [T,B,3D]
    gix_r = gix_all[..., :D]
    gix_z = gix_all[..., D:2 * D]
    gix_n = gix_all[..., 2 * D:]
    wih_c = wih[Et:]                                                 # [D,3D]
    wc_r, wc_z, wc_n = wih_c[:, :D], wih_c[:, D:2 * D], wih_c[:, 2 * D:]
    whh_d = params["dec_whh"]
    wh_r, wh_z, wh_n = whh_d[:, :D], whh_d[:, D:2 * D], whh_d[:, 2 * D:]
    bhh_d = params["dec_bhh"][None, :]                               # [1,3D]
    bh_r, bh_z, bh_n = bhh_d[:, :D], bhh_d[:, D:2 * D], bhh_d[:, 2 * D:]

    # h_0 = encoder_map(encoder_output)  (single matmul, hoisted out of kernel)
    h0 = (jnp.dot(encoder_output, params["dec_wmap"],
                  preferred_element_type=jnp.float32) + params["dec_bmap"])

    ctx_seq, h_seq = decoder_run(gix_r, gix_z, gix_n, encoder_states, h0,
                                 wc_r, wc_z, wc_n, wh_r, wh_z, wh_n,
                                 bh_r, bh_z, bh_n)

    # -------- classifier + dropout (hoisted, one lane-dense matmul) ----------
    N = T * B
    ctx_n = ctx_seq.reshape(N, D)
    h_n = h_seq.reshape(N, D)
    # F.dropout(p=0.3, training=True): inverted dropout, deterministic mask.
    kc, kh = jax.random.split(jax.random.PRNGKey(drop_seed))
    scale = 1.0 / (1.0 - DROP_P)
    keep_c = (jax.random.uniform(kc, (N, D)) >= DROP_P).astype(jnp.float32) * scale
    keep_h = (jax.random.uniform(kh, (N, D)) >= DROP_P).astype(jnp.float32) * scale

    wcls = params["dec_wcls"]                                        # [2D,V]
    logits_n = classifier_run(ctx_n, h_n, keep_c, keep_h,
                              wcls[:D], wcls[D:], params["dec_bcls"])
    V = logits_n.shape[-1]
    return jnp.transpose(logits_n.reshape(T, B, V), (1, 0, 2))       # [B,T,V]


# ----------------------------------------------------------------------------
# Deterministic parameter init (PyTorch-like uniform(-1/sqrt(fan), 1/sqrt(fan)))
# Weight layout: W_ih stored as [in, 3H] with PyTorch gate order (r, z, n).
# ----------------------------------------------------------------------------
def init_params(key, src_v, src_e, tgt_v, tgt_e, enc_h):
    dec_h = 2 * enc_h
    ks = jax.random.split(key, 16)

    def unif(k, shape, fan):
        b = 1.0 / math.sqrt(fan)
        return jax.random.uniform(k, shape, jnp.float32, -b, b)

    src_emb = jax.random.normal(ks[0], (src_v, src_e), jnp.float32).at[0].set(0.0)
    tgt_emb = jax.random.normal(ks[1], (tgt_v, tgt_e), jnp.float32).at[0].set(0.0)
    p = {"src_emb": src_emb, "tgt_emb": tgt_emb}

    # encoder bidirectional GRU (leading dim = direction: 0 forward, 1 backward)
    p["enc_wih"] = unif(ks[2], (2, src_e, 3 * enc_h), enc_h)
    p["enc_whh"] = unif(ks[3], (2, enc_h, 3 * enc_h), enc_h)
    p["enc_bih"] = unif(ks[4], (2, 3 * enc_h), enc_h)
    p["enc_bhh"] = unif(ks[5], (2, 3 * enc_h), enc_h)

    # decoder
    p["dec_wmap"] = unif(ks[6], (dec_h, dec_h), dec_h)
    p["dec_bmap"] = unif(ks[7], (1, dec_h), dec_h)
    p["dec_wih"] = unif(ks[8], (tgt_e + dec_h, 3 * dec_h), dec_h)
    p["dec_whh"] = unif(ks[9], (dec_h, 3 * dec_h), dec_h)
    p["dec_bih"] = unif(ks[10], (3 * dec_h,), dec_h)
    p["dec_bhh"] = unif(ks[11], (3 * dec_h,), dec_h)
    p["dec_wcls"] = unif(ks[12], (2 * dec_h, tgt_v), 2 * dec_h)
    p["dec_bcls"] = unif(ks[13], (1, tgt_v), 2 * dec_h)
    return p


if __name__ == "__main__":
    SRC_V, SRC_E = 40, 16      # source_num_embeddings, source_embedding_size
    TGT_V, TGT_E = 48, 16      # target_num_embeddings, target_embedding_size
    ENC_H = 32                 # encoding_size  (decoding_size = 64)
    B, S_SRC, S_TGT = 2, 8, 8

    root = jax.random.PRNGKey(0)
    kp, k1, k2 = jax.random.split(root, 3)
    params = init_params(kp, SRC_V, SRC_E, TGT_V, TGT_E, ENC_H)

    src = jax.random.randint(k1, (B, S_SRC), 1, SRC_V).astype(jnp.int32)
    tgt = jax.random.randint(k2, (B, S_TGT), 1, TGT_V).astype(jnp.int32)
    lengths = jnp.array([S_SRC, 5], dtype=jnp.int32)   # max length == S_SRC
    pos = jnp.arange(S_SRC, dtype=jnp.int32)[None, :]
    src = jnp.where(pos < lengths[:, None], src, 0)    # 0 = padding_idx

    out = text_nmt_forward(params, src, lengths, tgt)
    out = jax.block_until_ready(out)
    assert out.shape == (B, S_TGT, TGT_V), out.shape
    assert bool(jnp.all(jnp.isfinite(out)))
    print("KERNEL_OK")
</pallas_src>

<mosaic_0001>
module attributes {stable_mosaic.version = 11 : i64} {
  func.func @encoder_gru_kernel(%arg0: i32, %arg1: memref<1x8x2x32xf32, #tpu.memory_space<vmem>>, %arg2: memref<1x8x2x32xf32, #tpu.memory_space<vmem>>, %arg3: memref<1x8x2x32xf32, #tpu.memory_space<vmem>>, %arg4: memref<8x2x1xf32, #tpu.memory_space<vmem>>, %arg5: memref<1x32x32xf32, #tpu.memory_space<vmem>>, %arg6: memref<1x32x32xf32, #tpu.memory_space<vmem>>, %arg7: memref<1x32x32xf32, #tpu.memory_space<vmem>>, %arg8: memref<1x1x32xf32, #tpu.memory_space<vmem>>, %arg9: memref<1x1x32xf32, #tpu.memory_space<vmem>>, %arg10: memref<1x1x32xf32, #tpu.memory_space<vmem>>, %arg11: memref<1x8x2x32xf32, #tpu.memory_space<vmem>>, %arg12: memref<1x2x32xf32, #tpu.memory_space<vmem>>) attributes {dimension_semantics = [#tpu.dimension_semantics<parallel>], iteration_bounds = array<i64: 2>, scalar_prefetch = 0 : i64, scratch_operands = 0 : i64, tpu.core_type = #tpu.core_type<tc>, window_params = [{transform_indices = @transform_0, window_bounds = array<i64: 1, 8, 2, 32>}, {transform_indices = @transform_1, window_bounds = array<i64: 1, 8, 2, 32>}, {transform_indices = @transform_2, window_bounds = array<i64: 1, 8, 2, 32>}, {pipeline_mode = #tpu.pipeline_mode<synchronous>, transform_indices = @transform_3, window_bounds = array<i64: 8, 2, 1>}, {transform_indices = @transform_4, window_bounds = array<i64: 1, 32, 32>}, {transform_indices = @transform_5, window_bounds = array<i64: 1, 32, 32>}, {transform_indices = @transform_6, window_bounds = array<i64: 1, 32, 32>}, {transform_indices = @transform_7, window_bounds = array<i64: 1, 1, 32>}, {transform_indices = @transform_8, window_bounds = array<i64: 1, 1, 32>}, {transform_indices = @transform_9, window_bounds = array<i64: 1, 1, 32>}, {transform_indices = @transform_10, window_bounds = array<i64: 1, 8, 2, 32>}, {transform_indices = @transform_11, window_bounds = array<i64: 1, 2, 32>}]} {
    %c0 = arith.constant 0 : index
    %c0_0 = arith.constant 0 : index
    %c0_1 = arith.constant 0 : index
    %0 = vector.load %arg5[%c0, %c0_0, %c0_1] : memref<1x32x32xf32, #tpu.memory_space<vmem>>, vector<1x32x32xf32>
    %1 = vector.shape_cast %0 : vector<1x32x32xf32> to vector<32x32xf32>
    %c0_2 = arith.constant 0 : index
    %c0_3 = arith.constant 0 : index
    %c0_4 = arith.constant 0 : index
    %2 = vector.load %arg6[%c0_2, %c0_3, %c0_4] : memref<1x32x32xf32, #tpu.memory_space<vmem>>, vector<1x32x32xf32>
    %3 = vector.shape_cast %2 : vector<1x32x32xf32> to vector<32x32xf32>
    %c0_5 = arith.constant 0 : index
    %c0_6 = arith.constant 0 : index
    %c0_7 = arith.constant 0 : index
    %4 = vector.load %arg7[%c0_5, %c0_6, %c0_7] : memref<1x32x32xf32, #tpu.memory_space<vmem>>, vector<1x32x32xf32>
    %5 = vector.shape_cast %4 : vector<1x32x32xf32> to vector<32x32xf32>
    %c0_8 = arith.constant 0 : index
    %c0_9 = arith.constant 0 : index
    %c0_10 = arith.constant 0 : index
    %6 = vector.load %arg8[%c0_8, %c0_9, %c0_10] : memref<1x1x32xf32, #tpu.memory_space<vmem>>, vector<1x1x32xf32>
    %7 = vector.shape_cast %6 : vector<1x1x32xf32> to vector<1x32xf32>
    %c0_11 = arith.constant 0 : index
    %c0_12 = arith.constant 0 : index
    %c0_13 = arith.constant 0 : index
    %8 = vector.load %arg9[%c0_11, %c0_12, %c0_13] : memref<1x1x32xf32, #tpu.memory_space<vmem>>, vector<1x1x32xf32>
    %9 = vector.shape_cast %8 : vector<1x1x32xf32> to vector<1x32xf32>
    %c0_14 = arith.constant 0 : index
    %c0_15 = arith.constant 0 : index
    %c0_16 = arith.constant 0 : index
    %10 = vector.load %arg10[%c0_14, %c0_15, %c0_16] : memref<1x1x32xf32, #tpu.memory_space<vmem>>, vector<1x1x32xf32>
    %11 = vector.shape_cast %10 : vector<1x1x32xf32> to vector<1x32xf32>
    %cst = arith.constant 0.000000e+00 : f32
    %12 = vector.broadcast %cst : f32 to vector<2x32xf32>
    %c0_i32 = arith.constant 0 : i32
    %c8_i32 = arith.constant 8 : i32
    %13 = arith.addi %c0_i32, %c8_i32 : i32
    %c1_i32 = arith.constant 1 : i32
    %14 = scf.for %arg13 = %c0_i32 to %13 step %c1_i32 iter_args(%arg14 = %12) -> (vector<2x32xf32>)  : i32 {
      %c0_i32_21 = arith.constant 0 : i32
      %18 = arith.cmpi eq, %arg0, %c0_i32_21 : i32
      %c7_i32 = arith.constant 7 : i32
      %19 = arith.subi %c7_i32, %arg13 : i32
      %20 = arith.select %18, %arg13, %19 : i32
      %21 = arith.index_cast %20 : i32 to index
      %c0_22 = arith.constant 0 : index
      %c0_23 = arith.constant 0 : index
      %22 = vector.load %arg4[%21, %c0_22, %c0_23] : memref<8x2x1xf32, #tpu.memory_space<vmem>>, vector<1x2x1xf32>
      %23 = vector.shape_cast %22 : vector<1x2x1xf32> to vector<2x1xf32>
      %cst_24 = arith.constant dense<0.000000e+00> : vector<2x32xf32>
      %24 = tpu.matmul %arg14, %1, %cst_24 {dimension_numbers = #tpu.dot_dimension_numbers<[1], [0], [0], [1], [0, 0, 1, 1], [], []>} : vector<2x32xf32>, vector<32x32xf32>, vector<2x32xf32> -> vector<2x32xf32>
      %25 = vector.broadcast %7 : vector<1x32xf32> to vector<2x32xf32>
      %26 = arith.addf %24, %25 : vector<2x32xf32>
      %cst_25 = arith.constant dense<0.000000e+00> : vector<2x32xf32>
      %27 = tpu.matmul %arg14, %3, %cst_25 {dimension_numbers = #tpu.dot_dimension_numbers<[1], [0], [0], [1], [0, 0, 1, 1], [], []>} : vector<2x32xf32>, vector<32x32xf32>, vector<2x32xf32> -> vector<2x32xf32>
      %28 = vector.broadcast %9 : vector<1x32xf32> to vector<2x32xf32>
      %29 = arith.addf %27, %28 : vector<2x32xf32>
      %cst_26 = arith.constant dense<0.000000e+00> : vector<2x32xf32>
      %30 = tpu.matmul %arg14, %5, %cst_26 {dimension_numbers = #tpu.dot_dimension_numbers<[1], [0], [0], [1], [0, 0, 1, 1], [], []>} : vector<2x32xf32>, vector<32x32xf32>, vector<2x32xf32> -> vector<2x32xf32>
      %31 = vector.broadcast %11 : vector<1x32xf32> to vector<2x32xf32>
      %32 = arith.addf %30, %31 : vector<2x32xf32>
      %c0_27 = arith.constant 0 : index
      %33 = arith.index_cast %20 : i32 to index
      %c0_28 = arith.constant 0 : index
      %c0_29 = arith.constant 0 : index
      %34 = vector.load %arg1[%c0_27, %33, %c0_28, %c0_29] : memref<1x8x2x32xf32, #tpu.memory_space<vmem>>, vector<1x1x2x32xf32>
      %35 = vector.shape_cast %34 : vector<1x1x2x32xf32> to vector<2x32xf32>
      %36 = arith.addf %35, %26 : vector<2x32xf32>
      %37 = arith.negf %36 : vector<2x32xf32>
      %38 = math.exp %37 : vector<2x32xf32>
      %cst_30 = arith.constant 1.000000e+00 : f32
      %39 = vector.broadcast %cst_30 : f32 to vector<2x32xf32>
      %40 = arith.addf %39, %38 : vector<2x32xf32>
      %41 = arith.divf %39, %40 : vector<2x32xf32>
      %c0_31 = arith.constant 0 : index
      %42 = arith.index_cast %20 : i32 to index
      %c0_32 = arith.constant 0 : index
      %c0_33 = arith.constant 0 : index
      %43 = vector.load %arg2[%c0_31, %42, %c0_32, %c0_33] : memref<1x8x2x32xf32, #tpu.memory_space<vmem>>, vector<1x1x2x32xf32>
      %44 = vector.shape_cast %43 : vector<1x1x2x32xf32> to vector<2x32xf32>
      %45 = arith.addf %44, %29 : vector<2x32xf32>
      %46 = arith.negf %45 : vector<2x32xf32>
      %47 = math.exp %46 : vector<2x32xf32>
      %cst_34 = arith.constant 1.000000e+00 : f32
      %48 = vector.broadcast %cst_34 : f32 to vector<2x32xf32>
      %49 = arith.addf %48, %47 : vector<2x32xf32>
      %50 = arith.divf %48, %49 : vector<2x32xf32>
      %c0_35 = arith.constant 0 : index
      %51 = arith.index_cast %20 : i32 to index
      %c0_36 = arith.constant 0 : index
      %c0_37 = arith.constant 0 : index
      %52 = vector.load %arg3[%c0_35, %51, %c0_36, %c0_37] : memref<1x8x2x32xf32, #tpu.memory_space<vmem>>, vector<1x1x2x32xf32>
      %53 = vector.shape_cast %52 : vector<1x1x2x32xf32> to vector<2x32xf32>
      %54 = arith.mulf %41, %32 : vector<2x32xf32>
      %55 = arith.addf %53, %54 : vector<2x32xf32>
      %56 = math.tanh %55 : vector<2x32xf32>
      %cst_38 = arith.constant 1.000000e+00 : f32
      %57 = vector.broadcast %cst_38 : f32 to vector<2x32xf32>
      %58 = arith.subf %57, %50 : vector<2x32xf32>
      %59 = arith.mulf %58, %56 : vector<2x32xf32>
      %60 = arith.mulf %50, %arg14 : vector<2x32xf32>
      %61 = arith.addf %59, %60 : vector<2x32xf32>
      %62 = vector.broadcast %23 : vector<2x1xf32> to vector<2x32xf32>
      %63 = arith.mulf %62, %61 : vector<2x32xf32>
      %c0_39 = arith.constant 0 : index
      %64 = arith.index_cast %20 : i32 to index
      %c0_40 = arith.constant 0 : index
      %c0_41 = arith.constant 0 : index
      %65 = vector.load %arg11[%c0_39, %64, %c0_40, %c0_41] : memref<1x8x2x32xf32, #tpu.memory_space<vmem>>, vector<1x1x2x32xf32>
      %66 = vector.shape_cast %65 : vector<1x1x2x32xf32> to vector<2x32xf32>
      %67 = vector.shape_cast %63 : vector<2x32xf32> to vector<1x1x2x32xf32>
      tpu.vector_store %arg11[%c0_39, %64, %c0_40, %c0_41], %67 {strides = array<i32>} : memref<1x8x2x32xf32, #tpu.memory_space<vmem>>, vector<1x1x2x32xf32>,
      %68 = vector.broadcast %23 : vector<2x1xf32> to vector<2x32xf32>
      %69 = arith.mulf %68, %61 : vector<2x32xf32>
      %cst_42 = arith.constant 1.000000e+00 : f32
      %70 = vector.broadcast %cst_42 : f32 to vector<2x1xf32>
      %71 = arith.subf %70, %23 : vector<2x1xf32>
      %72 = vector.broadcast %71 : vector<2x1xf32> to vector<2x32xf32>
      %73 = arith.mulf %72, %arg14 : vector<2x32xf32>
      %74 = arith.addf %69, %73 : vector<2x32xf32>
      scf.yield %74 : vector<2x32xf32>
    }
    %c8_i32_17 = arith.constant 8 : i32
    %c0_18 = arith.constant 0 : index
    %c0_19 = arith.constant 0 : index
    %c0_20 = arith.constant 0 : index
    %15 = vector.load %arg12[%c0_18, %c0_19, %c0_20] : memref<1x2x32xf32, #tpu.memory_space<vmem>>, vector<1x2x32xf32>
    %16 = vector.shape_cast %15 : vector<1x2x32xf32> to vector<2x32xf32>
    %17 = vector.shape_cast %14 : vector<2x32xf32> to vector<1x2x32xf32>
    tpu.vector_store %arg12[%c0_18, %c0_19, %c0_20], %17 {strides = array<i32>} : memref<1x2x32xf32, #tpu.memory_space<vmem>>, vector<1x2x32xf32>,
    return
  }
  func.func @transform_0(%arg0: i32) -> (i32, i32, i32, i32) {
    %c0_i32 = arith.constant 0 : i32
    %c0_i32_0 = arith.constant 0 : i32
    %c0_i32_1 = arith.constant 0 : i32
    %c0_i32_2 = arith.constant 0 : i32
    return %arg0, %c0_i32, %c0_i32_0, %c0_i32_1 : i32, i32, i32, i32
  }
  func.func @transform_1(%arg0: i32) -> (i32, i32, i32, i32) {
    %c0_i32 = arith.constant 0 : i32
    %c0_i32_0 = arith.constant 0 : i32
    %c0_i32_1 = arith.constant 0 : i32
    %c0_i32_2 = arith.constant 0 : i32
    return %arg0, %c0_i32, %c0_i32_0, %c0_i32_1 : i32, i32, i32, i32
  }
  func.func @transform_2(%arg0: i32) -> (i32, i32, i32, i32) {
    %c0_i32 = arith.constant 0 : i32
    %c0_i32_0 = arith.constant 0 : i32
    %c0_i32_1 = arith.constant 0 : i32
    %c0_i32_2 = arith.constant 0 : i32
    return %arg0, %c0_i32, %c0_i32_0, %c0_i32_1 : i32, i32, i32, i32
  }
  func.func @transform_3(%arg0: i32) -> (i32, i32, i32) {
    %c0_i32 = arith.constant 0 : i32
    %c0_i32_0 = arith.constant 0 : i32
    %c0_i32_1 = arith.constant 0 : i32
    %c0_i32_2 = arith.constant 0 : i32
    return %c0_i32, %c0_i32_0, %c0_i32_1 : i32, i32, i32
  }
  func.func @transform_4(%arg0: i32) -> (i32, i32, i32) {
    %c0_i32 = arith.constant 0 : i32
    %c0_i32_0 = arith.constant 0 : i32
    %c0_i32_1 = arith.constant 0 : i32
    return %arg0, %c0_i32, %c0_i32_0 : i32, i32, i32
  }
  func.func @transform_5(%arg0: i32) -> (i32, i32, i32) {
    %c0_i32 = arith.constant 0 : i32
    %c0_i32_0 = arith.constant 0 : i32
    %c0_i32_1 = arith.constant 0 : i32
    return %arg0, %c0_i32, %c0_i32_0 : i32, i32, i32
  }
  func.func @transform_6(%arg0: i32) -> (i32, i32, i32) {
    %c0_i32 = arith.constant 0 : i32
    %c0_i32_0 = arith.constant 0 : i32
    %c0_i32_1 = arith.constant 0 : i32
    return %arg0, %c0_i32, %c0_i32_0 : i32, i32, i32
  }
  func.func @transform_7(%arg0: i32) -> (i32, i32, i32) {
    %c0_i32 = arith.constant 0 : i32
    %c0_i32_0 = arith.constant 0 : i32
    %c0_i32_1 = arith.constant 0 : i32
    return %arg0, %c0_i32, %c0_i32_0 : i32, i32, i32
  }
  func.func @transform_8(%arg0: i32) -> (i32, i32, i32) {
    %c0_i32 = arith.constant 0 : i32
    %c0_i32_0 = arith.constant 0 : i32
    %c0_i32_1 = arith.constant 0 : i32
    return %arg0, %c0_i32, %c0_i32_0 : i32, i32, i32
  }
  func.func @transform_9(%arg0: i32) -> (i32, i32, i32) {
    %c0_i32 = arith.constant 0 : i32
    %c0_i32_0 = arith.constant 0 : i32
    %c0_i32_1 = arith.constant 0 : i32
    return %arg0, %c0_i32, %c0_i32_0 : i32, i32, i32
  }
  func.func @transform_10(%arg0: i32) -> (i32, i32, i32, i32) {
    %c0_i32 = arith.constant 0 : i32
    %c0_i32_0 = arith.constant 0 : i32
    %c0_i32_1 = arith.constant 0 : i32
    %c0_i32_2 = arith.constant 0 : i32
    return %arg0, %c0_i32, %c0_i32_0, %c0_i32_1 : i32, i32, i32, i32
  }
  func.func @transform_11(%arg0: i32) -> (i32, i32, i32) {
    %c0_i32 = arith.constant 0 : i32
    %c0_i32_0 = arith.constant 0 : i32
    %c0_i32_1 = arith.constant 0 : i32
    return %arg0, %c0_i32, %c0_i32_0 : i32, i32, i32
  }
}

</mosaic_0001>

<bundles_post_ra>
// kernel: tpu_custom_call.1
= control target key start
LH: loop header
LB: loop body
LE: loop exit
PB: predicated region body
PF: predicated region fallthrough
CT: control target
= control target key end

     0   :  { %s2064_s0 = inlined_call_operand.hbm [shape: f32[2,8,2,32], index: 0, kind: input, shape index: {}]   ;;  %s2065_s1 = inlined_call_operand.hbm [shape: f32[2,8,2,32], index: 1, kind: input, shape index: {}]   ;;  %s2066_s2 = inlined_call_operand.hbm [shape: f32[2,8,2,32], index: 2, kind: input, shape index: {}]   ;;  %s2067_s3 = inlined_call_operand.vmem [shape: f32[8,2,1], index: 3, kind: input, shape index: {}]   ;;  %s2068_s4 = inlined_call_operand.hbm [shape: f32[2,32,32], index: 4, kind: input, shape index: {}]   ;;  %s2069_s5 = inlined_call_operand.hbm [shape: f32[2,32,32], index: 5, kind: input, shape index: {}]   ;;  %s2070_s6 = inlined_call_operand.hbm [shape: f32[2,32,32], index: 6, kind: input, shape index: {}]   ;;  %s2071_s7 = inlined_call_operand.vmem [shape: f32[2,1,32], index: 7, kind: input, shape index: {}]   ;;  %s2072_s8 = inlined_call_operand.vmem [shape: f32[2,1,32], index: 8, kind: input, shape index: {}]   ;;  %s2073_s9 = inlined_call_operand.vmem [shape: f32[2,1,32], index: 9, kind: input, shape index: {}]   ;;  %s2074_s10 = inlined_call_operand.hbm [shape: f32[2,8,2,32], index: 10, kind: output, shape index: {0}]   ;;  %s2075_s11 = inlined_call_operand.hbm [shape: f32[2,2,32], index: 11, kind: output, shape index: {1}]  }
   0x1   :  { %2098 = sst [smem:[#allocation30_spill]] %s2065_s1 }
   0x2   :  { %2099 = sst [smem:[#allocation31_spill]] %s2067_s3 }
   0x3   :  { %2100 = sst [smem:[#allocation32_spill]] %s2068_s4 }
   0x4   :  { %2101 = sst [smem:[#allocation33_spill]] %s2071_s7 }
   0x5   :  { %2102 = sst [smem:[#allocation34_spill]] %s2072_s8 }
   0x6   :  { %2103 = sst [smem:[#allocation35_spill]] %s2073_s9 }
   0x7   :  { %2104 = sst [smem:[#allocation36_spill]] %s2074_s10 }
   0x8   :  { %2105 = sst [smem:[#allocation37_spill]] %s2075_s11 }
   0x9   :  { %17 = vsyncpa [#allocation3], 0 }
   0xa   :  { %19 = vsyncpa [#allocation3 + $0x1], 0 }
   0xb   :  { %20 = vsyncpa [#allocation6], 0 }
   0xc   :  { %22 = vsyncpa [#allocation6 + $0x1], 0 }
   0xd   :  { %23 = vsyncpa [#allocation9], 0 }
   0xe   :  { %25 = vsyncpa [#allocation9 + $0x1], 0 }
   0xf   :  { %26 = vsyncpa [#allocation12], 0 }
  0x10   :  { %28 = vsyncpa [#allocation12 + $0x1], 0 }
  0x11   :  { %29 = vsyncpa [#allocation4], 0 }
  0x12   :  { %31 = vsyncpa [#allocation4 + $0x1], 0 }
  0x13   :  { %32 = vsyncpa [#allocation15], 0 }
  0x14   :  { %34 = vsyncpa [#allocation15 + $0x1], 0  ;;  %s1667_s17 = smov 0   ;;  %s1669_s18 = smov 0  }
  0x15   :  { %s1671_s19 = smov 0   ;;  %s1673_s20 = smov 0  }
  0x16 LB: > { %2106 = sst [smem:[#allocation22_spill]] %s1578_s17  ;;  %s1688_s21 = sadd.s32 4294967295, %s1590_s20   ;;  %s1590_s20 = sphi %s1673_s20, %s2142_s20   ;;  %s1586_s19 = sphi %s1671_s19, %s2144_s19   ;;  %s1582_s18 = sphi %s1669_s18, %s2146_s18   ;;  %s1578_s17 = sphi %s1667_s17, %s2145_s17  }
  0x17   : > { %2107 = sst [smem:[#allocation23_spill]] %s1586_s19  ;;  %s1132_s22 = sadd.s32 4294967294, %s1590_s20  }
  0x18   : > { %2108 = sst [smem:[#allocation24_spill]] %s1590_s20  ;;  %s1692_s23 = sadd.s32 1, %s1590_s20  }
  0x19   : > { %2109 = sst [smem:[#allocation25_spill]] %s1688_s21  ;;  %s47_s24 = sadd.s32 1, %s1586_s19 }
  0x1a   : > { %2110 = sst [smem:[#allocation26_spill]] %s1692_s23  ;;  %s44_s25 = ssub.s32 %s1590_s20, %s1692_s23 }
  0x1b   : > { %p54_p0 = scmp.ne.s32.totalorder %s1586_s19, %s1582_s18  ;;  %p45_p1 = scmp.eq.s32.totalorder %s44_s25, 0 }
  0x1c   : > { %p55_p2 = scmp.eq.s32.totalorder %s1590_s20, 0  ;;  %p60_p3 = scmp.ne.s32.totalorder %s1582_s18, %s1578_s17 }
  0x1d   : > { %p61_p4 = scmp.eq.s32.totalorder %s1688_s21, 0  ;;  %p313_p7 = scmp.eq.s32.totalorder %s1688_s21, 1 }
  0x1e   : > { %s1704_s26 = scalar_select %p45_p1, %s1586_s19, %s47_s24  }
  0x1f   : > { %p56_p5 = por %p55_p2, %p54_p0  ;;  %p1708_p6 = por %p61_p4, %p60_p3 }
  0x20   : > { %2111 = sst [smem:[#allocation27_spill]] %s1704_s26  ;;  %p319_p8 = scmp.eq.s32.totalorder %s1132_s22, 1 }
  0x21   : > { %p1224_p10 = scmp.lt.s32.totalorder %s1590_s20, 2  ;;  %p1715_p11 = por %p313_p7, %p54_p0 }
  0x22   : > { %p1719_p12 = por %p319_p8, %p60_p3  ;;  %s1724_s30 = sand.u32 1, %s1586_s19  }
  0x23   : > { %s2113_s28 = scalar_select %p1715_p11, 1, 0 }
  0x24   : > { %s2115_s29 = scalar_select %p1719_p12, 1, 0 }
  0x25   : > { %2114 = sst [smem:[#allocation28_spill]] %s2113_s28  ;;  %s1727_s12 = sshll.u32 %s1590_s20, 4 }
  0x26   : > { %2116 = sst [smem:[#allocation29_spill]] %s2115_s29  ;;  %s1730_s13 = sshll.u32 %s1724_s30, 4 }
  0x27   : > { %p1732_p13 = pnand %p1224_p10, %p56_p5  ;;  %s2082_s15 = sand.u32 1, %s1590_s20  }
  0x28   : > { %s2118_s1 = sld [smem:[#allocation30_spill]]  ;;  %s394_s25 = scalar_lea.vmem [#allocation5], %s1730_s13 }
  0x29   : > { %s402_s26 = sshll.u32 %s394_s25, 4  ;;  %p1153_p0 = scmp.ge.s32.totalorder %s1590_s20, 1  ;;  %s403_s26 = int_to_ptr.vmem [resolvable:$true] %s402_s26 }
  0x2a   : > { %s1745_s23 = scalar_lea.sflag [#allocation6], %s2082_s15  ;;  %p1749_p2 = pneg %p1732_p13 }
  0x2e   : > { %s399_s24 = scalar_lea.hbm %s2118_s1, %s1727_s12 }
  0x2f   : > { %s400_s19 = sshll.u32 %s399_s24, 4  ;;  %s1299_s24 = scalar_lea.hbm %s2118_s1, 32  ;;  %s401_s19 = int_to_ptr.hbm [resolvable:$true] %s400_s19 }
  0x30   : > { %s1292_s29 = sshra.s32 %s401_s19, 4  ;;  %s1293_s29 = int_to_ptr.hbm [resolvable:$true] %s1292_s29 }
  0x31   : > { %s1294_s17 = scalar_lea.hbm %s1293_s29, 16  ;;  %p1300_p7 = scmp.lt.s32.totalorder %s1293_s29, %s2118_s1 }
  0x32   : > { %p1295_p1 = scmp.ne.s32.totalorder %s1293_s29, %s1294_s17  ;;  %p1301_p8 = scmp.lt.s32.totalorder %s1299_s24, %s1294_s17 }
  0x34   : > { %p1297_p3 = pnand %p1749_p2, %p1295_p1  ;;  %p1302_p10 = por %p1301_p8, %p1300_p7 }
  0x36   : > { %p1298_p5 = pneg %p1297_p3 }
  0x38   : > { %p1303_p9 = pnand %p1302_p10, %p1298_p5 }
  0x3a   : > { %1306 = shalt.err (!%p1303_p9)
}
  0x3b   : > { %s2086_s10 = smov 32   ;;  %s2088_s28 = smov 2  }
  0x3c   : > { %1204 = dma.hbm_to_vmem [thread:$0]  (!%p1732_p13), %s401_s19, 256, %s403_s26, %s1745_s23, %s2086_s10, %s2086_s10, %s2088_s28  }
  0x3d   : > { %p516_p1 = scmp.lt.s32.totalorder %s1590_s20, 3  ;;  %s1769_s17 = sshll.u32 %s1724_s30, 5 }
  0x3e   : > { %s1772_s29 = sshll.u32 %s1590_s20, 5  ;;  %s2121_s4 = sld [smem:[#allocation32_spill]] }
  0x3f   : > { %p1776_p9 = pnand %p1153_p0, %p516_p1  ;;  %s438_s25 = scalar_lea.vmem [#allocation8], %s1769_s17 }
  0x40   : > { %s446_s1 = sshll.u32 %s438_s25, 4  ;;  %s2122_s26 = sand.u32 1, %s1590_s20   ;;  %s447_s1 = int_to_ptr.vmem [resolvable:$true] %s446_s1 }
  0x41   : > { %s1787_s10 = scalar_lea.sflag [#allocation9], %s2122_s26 }
  0x44   : > { %s443_s24 = scalar_lea.hbm %s2121_s4, %s1772_s29  ;;  %s1329_s16 = scalar_lea.hbm %s2121_s4, 64 }
  0x45   : > { %s444_s19 = sshll.u32 %s443_s24, 4  ;;  %s445_s19 = int_to_ptr.hbm [resolvable:$true] %s444_s19 }
  0x46   : > { %s1322_s28 = sshra.s32 %s445_s19, 4  ;;  %s1323_s28 = int_to_ptr.hbm [resolvable:$true] %s1322_s28 }
  0x47   : > { %s1324_s3 = scalar_lea.hbm %s1323_s28, 32  ;;  %p1330_p7 = scmp.lt.s32.totalorder %s1323_s28, %s2121_s4 }
  0x48   : > { %p1325_p3 = scmp.ne.s32.totalorder %s1323_s28, %s1324_s3  ;;  %p1331_p8 = scmp.lt.s32.totalorder %s1329_s16, %s1324_s3 }
  0x4a   : > { %p1327_p0 = pnand %p1325_p3, %p1749_p2  ;;  %p1332_p10 = por %p1331_p8, %p1330_p7 }
  0x4c   : > { %p1328_p5 = pneg %p1327_p0 }
  0x4e   : > { %p1333_p1 = pnand %p1332_p10, %p1328_p5 }
  0x50   : > { %1336 = shalt.err (!%p1333_p1)
}
  0x51   : > { %s2094_s24 = smov 128   ;;  %s2096_s25 = smov 8  }
  0x52   : > { %1210 = dma.hbm_to_vmem [thread:$0]  (!%p1732_p13), %s445_s19, 512, %s447_s1, %s1787_s10, %s2094_s24, %s2094_s24, %s2096_s25  }
  0x53   : > { %s377_s3 = scalar_lea.hbm %s2064_s0, %s1727_s12  ;;  %s372_s28 = scalar_lea.vmem [#allocation2], %s1730_s13 }
  0x54   : > { %s378_s9 = sshll.u32 %s377_s3, 4  ;;  %s380_s26 = sshll.u32 %s372_s28, 4  ;;  %s379_s9 = int_to_ptr.hbm [resolvable:$true] %s378_s9  ;;  %s381_s26 = int_to_ptr.vmem [resolvable:$true] %s380_s26 }
  0x55   : > { %s369_s16 = scalar_lea.sflag [#allocation3], %s1724_s30  ;;  %s1352_s22 = sshra.s32 %s379_s9, 4  ;;  %s1353_s22 = int_to_ptr.hbm [resolvable:$true] %s1352_s22 }
  0x56   : > { %s1354_s4 = scalar_lea.hbm %s1353_s22, 16  ;;  %s1359_s1 = scalar_lea.hbm %s2064_s0, 32 }
  0x57   : > { %p1355_p3 = scmp.ne.s32.totalorder %s1353_s22, %s1354_s4  ;;  %p1360_p7 = scmp.lt.s32.totalorder %s1353_s22, %s2064_s0 }
  0x58   : > { %p1361_p8 = scmp.lt.s32.totalorder %s1359_s1, %s1354_s4 }
  0x59   : > { %p1357_p0 = pnand %p1355_p3, %p1749_p2 }
  0x5a   : > { %p1362_p10 = por %p1361_p8, %p1360_p7 }
  0x5b   : > { %p1358_p5 = pneg %p1357_p0 }
  0x5d   : > { %p1363_p1 = pnand %p1362_p10, %p1358_p5 }
  0x5f   : > { %1366 = shalt.err (!%p1363_p1)
}
  0x60   : > { %s2123_s7 = smov 2   ;;  %s2124_s3 = smov 32  }
  0x61   : > { %1201 = dma.hbm_to_vmem [thread:$0]  (!%p1732_p13), %s379_s9, 256, %s381_s26, %s369_s16, %s2124_s3, %s2124_s3, %s2123_s7  }
  0x62   : > { %s421_s21 = scalar_lea.hbm %s2066_s2, %s1727_s12  ;;  %s416_s19 = scalar_lea.vmem [#allocation7], %s1730_s13 }
  0x63   : > { %s422_s24 = sshll.u32 %s421_s21, 4  ;;  %s424_s22 = sshll.u32 %s416_s19, 4  ;;  %s423_s24 = int_to_ptr.hbm [resolvable:$true] %s422_s24  ;;  %s425_s22 = int_to_ptr.vmem [resolvable:$true] %s424_s22 }
  0x64   : > { %s1382_s4 = sshra.s32 %s423_s24, 4  ;;  %s1389_s9 = scalar_lea.hbm %s2066_s2, 32  ;;  %s1383_s4 = int_to_ptr.hbm [resolvable:$true] %s1382_s4 }
  0x65   : > { %s1384_s1 = scalar_lea.hbm %s1383_s4, 16  ;;  %p1390_p7 = scmp.lt.s32.totalorder %s1383_s4, %s2066_s2 }
  0x66   : > { %p1385_p3 = scmp.ne.s32.totalorder %s1383_s4, %s1384_s1  ;;  %p1391_p8 = scmp.lt.s32.totalorder %s1389_s9, %s1384_s1 }
  0x68   : > { %p1387_p0 = pnand %p1385_p3, %p1749_p2  ;;  %p1392_p10 = por %p1391_p8, %p1390_p7 }
  0x6a   : > { %p1388_p5 = pneg %p1387_p0 }
  0x6c   : > { %p1393_p1 = pnand %p1392_p10, %p1388_p5 }
  0x6e   : > { %1396 = shalt.err (!%p1393_p1)
}
  0x6f   : > { %1207 = dma.hbm_to_vmem [thread:$0]  (!%p1732_p13), %s423_s24, 256, %s425_s22, %s1745_s23, %s2124_s3, %s2124_s3, %s2123_s7  }
  0x70   : > { %s465_s25 = scalar_lea.hbm %s2069_s5, %s1772_s29  ;;  %s460_s20 = scalar_lea.vmem [#allocation10], %s1769_s17 }
  0x71   : > { %s466_s28 = sshll.u32 %s465_s25, 4  ;;  %s468_s21 = sshll.u32 %s460_s20, 4  ;;  %s467_s28 = int_to_ptr.hbm [resolvable:$true] %s466_s28  ;;  %s469_s21 = int_to_ptr.vmem [resolvable:$true] %s468_s21 }
  0x72   : > { %s1412_s19 = sshra.s32 %s467_s28, 4  ;;  %s1419_s23 = scalar_lea.hbm %s2069_s5, 64  ;;  %s1413_s19 = int_to_ptr.hbm [resolvable:$true] %s1412_s19 }
  0x73   : > { %s1414_s4 = scalar_lea.hbm %s1413_s19, 32  ;;  %p1420_p7 = scmp.lt.s32.totalorder %s1413_s19, %s2069_s5 }
  0x74   : > { %p1415_p3 = scmp.ne.s32.totalorder %s1413_s19, %s1414_s4  ;;  %p1421_p8 = scmp.lt.s32.totalorder %s1419_s23, %s1414_s4 }
  0x76   : > { %p1417_p0 = pnand %p1415_p3, %p1749_p2  ;;  %p1422_p10 = por %p1421_p8, %p1420_p7 }
  0x78   : > { %p1418_p5 = pneg %p1417_p0 }
  0x7a   : > { %p1423_p1 = pnand %p1422_p10, %p1418_p5 }
  0x7c   : > { %1426 = shalt.err (!%p1423_p1)
}
  0x7d   : > { %s2125_s3 = smov 8   ;;  %s2126_s22 = smov 128  }
  0x7e   : > { %1213 = dma.hbm_to_vmem [thread:$0]  (!%p1732_p13), %s467_s28, 512, %s469_s21, %s1787_s10, %s2126_s22, %s2126_s22, %s2125_s3  }
  0x7f   : > { %s487_s16 = scalar_lea.hbm %s2070_s6, %s1772_s29  ;;  %s482_s12 = scalar_lea.vmem [#allocation11], %s1769_s17 }
  0x80   : > { %s490_s13 = sshll.u32 %s482_s12, 4  ;;  %s488_s25 = sshll.u32 %s487_s16, 4  ;;  %s491_s13 = int_to_ptr.vmem [resolvable:$true] %s490_s13  ;;  %s489_s25 = int_to_ptr.hbm [resolvable:$true] %s488_s25 }
  0x81   : > { %s479_s20 = scalar_lea.sflag [#allocation12], %s1724_s30  ;;  %s1442_s19 = sshra.s32 %s489_s25, 4  ;;  %s1443_s19 = int_to_ptr.hbm [resolvable:$true] %s1442_s19 }
  0x82   : > { %s1444_s4 = scalar_lea.hbm %s1443_s19, 32  ;;  %s1449_s10 = scalar_lea.hbm %s2070_s6, 64 }
  0x83   : > { %p1445_p3 = scmp.ne.s32.totalorder %s1443_s19, %s1444_s4  ;;  %p1450_p7 = scmp.lt.s32.totalorder %s1443_s19, %s2070_s6 }
  0x84   : > { %p1451_p8 = scmp.lt.s32.totalorder %s1449_s10, %s1444_s4 }
  0x85   : > { %p1447_p0 = pnand %p1445_p3, %p1749_p2 }
  0x86   : > { %p1452_p10 = por %p1451_p8, %p1450_p7 }
  0x87   : > { %p1448_p5 = pneg %p1447_p0 }
  0x89   : > { %p1453_p1 = pnand %p1452_p10, %p1448_p5 }
  0x8b   : > { %1456 = shalt.err (!%p1453_p1)
}
  0x8c   : > { %1216 = dma.hbm_to_vmem [thread:$0]  (!%p1732_p13), %s489_s25, 512, %s491_s13, %s479_s20, %s2126_s22, %s2126_s22, %s2125_s3  }
  0x8d   : > { %520 = sbr.rel (%p1776_p9) target bundleno = 382 (0x17e), region = 60  ;;  %s1882_s11 = sand.u32 (!%p1776_p9), 1, %s1582_s18  }
  0x8e   : > { %s1885_s30 = sshll.u32 (!%p1776_p9), %s1882_s11, 4  ;;  %s523_s17 = scalar_lea.sflag (!%p1776_p9), [#allocation3], %s1882_s11 }
  0x8f   : > { %s526_s29 = scalar_lea.vmem (!%p1776_p9), [#allocation2], %s1885_s30 }
  0x92   : > { %1553 = dma.done.wait (%p1708_p6), %s523_s17, 256  }
  0x93   : > { %1555 = vsyncadd (%p1708_p6), %s523_s17, 4294967040  ;;  %s2127_s14 = sld [smem:[#allocation25_spill]]  ;;  %s536_s24 = scalar_lea.vmem [#allocation5], %s1885_s30 }
  0x99   : > { %s532_s15 = sand.u32 1, %s2127_s14  }
  0x9a   : > { %s533_s23 = scalar_lea.sflag [#allocation6], %s532_s15 }
  0x9b   : > { %1557 = dma.done.wait (%p1708_p6), %s533_s23, 512  }
  0x9c   : > { %1559 = vsyncadd (%p1708_p6), %s533_s23, 4294966784  ;;  %s1157_s7 = sshll.u32 %s1882_s11, 5  ;;  %s546_s3 = scalar_lea.vmem [#allocation7], %s1885_s30 }
  0x9d   : > { %s553_s22 = scalar_lea.sflag [#allocation9], %s532_s15  ;;  %s556_s9 = scalar_lea.vmem [#allocation8], %s1157_s7 }
  0x9e   : > { %1561 = dma.done.wait (%p1708_p6), %s553_s22, 1024  }
  0x9f   : > { %1563 = vsyncadd (%p1708_p6), %s553_s22, 4294966272  ;;  %s566_s26 = scalar_lea.vmem [#allocation10], %s1157_s7  ;;  %s573_s16 = scalar_lea.sflag [#allocation12], %s1882_s11 }
  0xa0   : > { %s576_s12 = scalar_lea.vmem [#allocation11], %s1157_s7 }
  0xa1   : > { %1565 = dma.done.wait (%p1708_p6), %s573_s16, 512  }
  0xa2   : > { %1567 = vsyncadd (%p1708_p6), %s573_s16, 4294966784  ;;  %p655_p13 = scmp.lt.s32.totalorder %s2127_s14, 1  ;;  %s1161_s13 = sshll.u32 %s1882_s11, 1  ;;  %v1916_v0 = vld [vmem:[%s556_s9] sm:$0xff]  ;;  %v1918_v1 = vld [vmem:[%s556_s9 + $0x8] sm:$0xff]  ;;  %v1955_v15 = vmov 0.0  }
  0xa3   : > { %s2128_s19 = sld [smem:[#allocation33_spill]]  ;;  %v1920_v2 = vld [vmem:[%s556_s9 + $0x10] sm:$0xff]  ;;  %v1928_v3 = vld [vmem:[%s556_s9 + $0x18] sm:$0xff]  ;;  %v1930_v4 = vld [vmem:[%s566_s26] sm:$0xff]  ;;  %s1953_s23 = scalar_lea.vmem [#allocation14], %s1161_s13 }
  0xa4   : > { %s2148_s14 = smov (!%p655_p13, %s2127_s14), 1  ;;  %s2129_s8 = sld [smem:[#allocation34_spill]]  ;;  %v1932_v5 = vld [vmem:[%s566_s26 + $0x8] sm:$0xff]  ;;  %v1934_v6 = vld [vmem:[%s566_s26 + $0x10] sm:$0xff]  ;;  %v1936_v7 = vld [vmem:[%s566_s26 + $0x18] sm:$0xff] }
  0xa5   : > { %s2130_s17 = sld [smem:[#allocation35_spill]]  ;;  %v1938_v8 = vld [vmem:[%s576_s12] sm:$0xff]  ;;  %v1940_v9 = vld [vmem:[%s576_s12 + $0x8] sm:$0xff]  ;;  %v1942_v10 = vld [vmem:[%s576_s12 + $0x10] sm:$0xff]  ;;  %s1957_s7 = smov 0  }
  0xa6   : > { %v1944_v11 = vld [vmem:[%s576_s12 + $0x18] sm:$0xff] }
  0xa9   : > { %s657_s4 = scalar_lea.vmem %s2128_s19, %s2148_s14 }
  0xaa   : > { %s660_s10 = scalar_lea.vmem %s2129_s8, %s2148_s14  ;;  %v1946_v12 = vld [vmem:[%s657_s4] sm:$0x1] }
  0xab   : > { %s663_s15 = scalar_lea.vmem %s2130_s17, %s2148_s14  ;;  %v1948_v13 = vld [vmem:[%s660_s10] sm:$0x1]  ;;  %s647_s14 = scalar_lea.vmem [#allocation13], %s1885_s30 }
  0xac   : > { %v1950_v14 = vld [vmem:[%s663_s15] sm:$0x1] }
  0xad LB: >> { %711 = vmatpush.msra.mxu0 %v1928_v3  ;;  %734 = vmatpush.msra.mxu1 %v1936_v7  ;;  %v1604_v16 = vmov 0   ;;  %s687_s9 = ssub.s32 7, %s1598_s7  ;;  %vm695_vm0 = vcmask 261120   ;;  %s2132_s25 = sld [smem:[#allocation31_spill]]  ;;  %v693_v19 = vperm.slane %v1946_v12, 0  ;;  %v720_v20 = vperm.slane %v1948_v13, 0  ;;  %s1598_s7 = sphi %s1957_s7, %s684_s7   ;;  %v1594_v15 = vphi %v1955_v15, %v2133_v15  }
  0xae   : >> { %757 = vmatpush.msra.mxu2 %v1944_v11  ;;  %1281 = vset.pattern.permute.xlu0 %v1604_v16  ;;  %s688_s26 = scalar_select %p61_p4, %s1598_s7, %s687_s9  ;;  %v743_v39 = vperm.slane %v1950_v14, 0  ;;  %vm825_vm9 = vcmask 254976  }
  0xaf   : >> { %712 = vmatpush.msra.mxu0 %v1920_v2  ;;  %735 = vmatpush.msra.mxu1 %v1934_v6  ;;  %s684_s7 = sadd.s32 1, %s1598_s7  }
  0xb0   : >> { %758 = vmatpush.msra.mxu2 %v1942_v10  ;;  %s1978_s16 = sshll.u32 %s688_s26, 1  ;;  %p681_p6 = scmp.ge.s32.totalorder %s684_s7, 8  }
  0xb1   : >> { %713 = vmatpush.msra.mxu0 %v1918_v1  ;;  %736 = vmatpush.msra.mxu1 %v1932_v5  ;;  %s765_s19 = scalar_lea.vmem %s526_s29, %s1978_s16 [#allocation2]  ;;  %s787_s4 = scalar_lea.vmem %s536_s24, %s1978_s16 [#allocation5] }
  0xb2   : >> { %759 = vmatpush.msra.mxu2 %v1940_v9  ;;  %v766_v22 = vld [vmem:[%s765_s19] sm:$0x3]  ;;  %s809_s1 = scalar_lea.vmem %s546_s3, %s1978_s16 [#allocation7]  ;;  %s824_s27 = scalar_lea.vmem %s647_s14, %s1978_s16 [#allocation13] }
  0xb3   : >> { %714 = vmatpush.msra.mxu0 %v1916_v0  ;;  %737 = vmatpush.msra.mxu1 %v1930_v4  ;;  %s690_s20 = scalar_lea.vmem %s2132_s25, %s1978_s16  ;;  %v788_v24 = vld [vmem:[%s787_s4] sm:$0x3]  ;;  %s2134_s8 = sld [smem:[#allocation25_spill]] (%p681_p6) }
  0xb4   : >> { %1163 = vmatmul.msk.f32.vlgmr.msra.gmra.mxu0 %vm695_vm0, %v1594_v15  ;;  %1164 = vmatmul.msk.f32.vlgmr.msra.gmra.mxu1 %vm695_vm0, %v1594_v15  ;;  %v691_v17 = vld [vmem:[%s690_s20] sm:$0x3]  ;;  %s2136_s15 = sld [smem:[#allocation36_spill]] (%p681_p6)  ;;  %s855_s9 = sshll.u32 (%p681_p6), %s647_s14, 4  ;;  %s856_s9 = int_to_ptr.vmem [resolvable:$true] %s855_s9 }
  0xb5   : >> { %760 = vmatpush.msra.mxu2 %v1938_v8  ;;  %820 = vperm.xlu0 %1281, %v691_v17   ;;  %v827_v18 = vsub.f32 1.0, %v691_v17  ;;  %v810_v52 = vld [vmem:[%s809_s1] sm:$0x3]  ;;  %s838_s16 = scalar_lea.sflag (%p681_p6), [#allocation4], %s1882_s11 }
  0xb6   : >> { %1165 = vmatmul.msk.f32.vlgmr.msra.gmra.mxu2 %vm695_vm0, %v1594_v15 }
  0xb9   : > { %s1181_s28 = sshll.u32 (%p681_p6), %s2134_s8, 4 }
  0xba   : > { %s854_s22 = scalar_lea.hbm (%p681_p6), %s2136_s15, %s1181_s28  ;;  %s1492_s3 = scalar_lea.hbm (%p681_p6), %s2136_s15, 32 }
  0xbb   : > { %s857_s26 = sshll.u32 (%p681_p6), %s854_s22, 4  ;;  %s858_s26 = int_to_ptr.hbm [resolvable:$true] %s857_s26 }
  0xbc   : > { %s1486_s12 = sshra.s32 (%p681_p6), %s858_s26, 4  ;;  %s1487_s12 = int_to_ptr.hbm [resolvable:$true] %s1486_s12 }
  0xbd   : >> { %830 = vperm.xlu0 %1281, %v827_v18   ;;  %s1488_s7 = scalar_lea.hbm (%p681_p6), %s1487_s12, 16  ;;  %p1493_p3 = scmp.lt.s32.totalorder (%p681_p6), %s1487_s12, %s2136_s15 }
  0xbe   : > { %p1489_p4 = scmp.ne.s32.totalorder (%p681_p6), %s1487_s12, %s1488_s7  ;;  %p1494_p0 = scmp.lt.s32.totalorder (%p681_p6), %s1492_s3, %s1488_s7 }
  0xc0   : > { %p1490_p2 = pnand (%p681_p6), %p1489_p4, %p1715_p11  ;;  %p1495_p5 = por (%p681_p6), %p1494_p0, %p1493_p3 }
  0xc2   : > { %p1491_p9 = pneg (%p681_p6), %p1490_p2 }
  0xc4   : > { %p1496_p7 = pnand (%p681_p6), %p1495_p5, %p1491_p9 }
 0x127   : >> { %v821_v58 = vpop.permute.xlu0 %820 }
 0x12f   : >> { %v831_v18 = vpop.permute.xlu0 %830 }
 0x131   : >> { %v716_v21 = vpop.f32.mrf.mxu0  ;;  %v739_v23 = vpop.f32.mrf.mxu1 }
 0x132   : >> { %v717_v25 = vadd.f32 %v716_v21, %v693_v19  ;;  %v740_v26 = vadd.f32 %v739_v23, %v720_v20  ;;  %v833_v21 = vmul.f32 %v1594_v15, %v831_v18 }
 0x134   : >> { %v767_v27 = vadd.f32 %v766_v22, %v717_v25  ;;  %v789_v28 = vadd.f32 %v788_v24, %v740_v26 }
 0x136   : >> { %v1166_v29 = vmul.f32 -1.442695, %v767_v27  ;;  %v1167_v30 = vmul.f32 -1.442695, %v789_v28 }
 0x138   : >> { %1282 = vpow2.f32 %v1166_v29 }
 0x139   : >> { %1284 = vpow2.f32 %v1167_v30  ;;  %v762_v41 = vpop.f32.mrf.mxu2 }
 0x13a   : >> { %v763_v47 = vadd.f32 %v762_v41, %v743_v39 }
 0x13e   : >> { %v1283_v31 = vpop.eup %1282 }
 0x13f   : >> { %v1285_v32 = vpop.eup %1284  ;;  %v771_v33 = vadd.f32 1.0, %v1283_v31 }
 0x140   : >> { %v793_v34 = vadd.f32 1.0, %v1285_v32 }
 0x141   : >> { %1286 = vrcp.f32 %v771_v33  ;;  %v783_v42 = vand.u32 2147483648, %v771_v33  ;;  %v781_v45 = vand.u32 2147483647, %v771_v33  ;;  %vm777_vm2 = vweird.f32 %v771_v33 }
 0x142   : >> { %1288 = vrcp.f32 %v793_v34  ;;  %vm799_vm5 = vweird.f32 %v793_v34  ;;  %v805_v55 = vand.u32 2147483648, %v793_v34  ;;  %v803_v56 = vand.u32 2147483647, %v793_v34 }
 0x143   : >> { %v784_v49 = vor.u32 1.1754944e-38, %v783_v42  ;;  %vm782_vm4 = vcmp.eq.f32.partialorder %v781_v45, 8.507059e+37 }
 0x144   : >> { %v806_v60 = vor.u32 1.1754944e-38, %v805_v55  ;;  %vm804_vm8 = vcmp.eq.f32.partialorder %v803_v56, 8.507059e+37 }
 0x147   : >> { %v1287_v35 = vpop.eup %1286 }
 0x148   : >> { %v1289_v36 = vpop.eup %1288  ;;  %v773_v37 = vmul.f32 %v1287_v35, %v771_v33  ;;  %vm778_vm1 = vweird.f32 %v1287_v35 }
 0x149   : >> { %v795_v38 = vmul.f32 %v1289_v36, %v793_v34  ;;  %vm779_vm3 = vmor %vm777_vm2, %vm778_vm1  ;;  %vm800_vm6 = vweird.f32 %v1289_v36 }
 0x14a   : >> { %v774_v40 = vsub.f32 1.0, %v773_v37  ;;  %vm801_vm7 = vmor %vm799_vm5, %vm800_vm6 }
 0x14b   : >> { %v796_v43 = vsub.f32 1.0, %v795_v38 }
 0x14c   : >> { %v775_v44 = vmul.f32 %v1287_v35, %v774_v40 }
 0x14d   : >> { %v797_v46 = vmul.f32 %v1289_v36, %v796_v43 }
 0x14e   : >> { %v776_v48 = vadd.f32 %v1287_v35, %v775_v44 }
 0x14f   : >> { %v798_v53 = vadd.f32 %v1289_v36, %v797_v46 }
 0x150   : >> { %v780_v50 = vsel %vm779_vm3, %v1287_v35, %v776_v48 }
 0x151   : >> { %v785_v51 = vsel %vm782_vm4, %v784_v49, %v780_v50  ;;  %v802_v59 = vsel %vm801_vm7, %v1289_v36, %v798_v53 }
 0x152   : >> { %v811_v54 = vmul.f32 %v785_v51, %v763_v47  ;;  %v807_v61 = vsel %vm804_vm8, %v806_v60, %v802_v59 }
 0x153   : >> { %v814_v62 = vsub.f32 1.0, %v807_v61  ;;  %v816_v17 = vmul.f32 %v1594_v15, %v807_v61 }
 0x154   : >> { %v812_v57 = vadd.f32 %v811_v54, %v810_v52 }
 0x156   : >> { %1290 = vtanh.f32 %v812_v57 }
 0x15c   : >> { %v1291_v63 = vpop.eup %1290 }
 0x15d   : >> { %v815_v16 = vmul.f32 %v1291_v63, %v814_v62 }
 0x15f   : >> { %v817_v19 = vadd.f32 %v816_v17, %v815_v16 }
 0x161   : >> { %v823_v20 = vmul.f32 %v821_v58, %v817_v19  ;;  %683 = sbr.rel (!%p681_p6) target bundleno = 173 (0xad), region = 204 }
 0x163   : >> { %826 = vst.msk [vmem:[%s824_s27] sm:$0x3] %vm825_vm9, %v823_v20  ;;  %v834_v22 = vadd.f32 %v833_v21, %v823_v20  }
 0x165   : >> { %v2133_v15 = vmov %v834_v22  ;;  %836 = vst.msk [vmem:[%s1953_s23] sm:$0x3] (%p681_p6), %vm825_vm9, %v834_v22 }
 0x166   : > { %1499 = shalt.err (!%p1496_p7)
}
 0x167   : > { %s1605_s30 = smov 32   ;;  %s1606_s14 = smov 2  }
 0x168   : > { %1194 = dma.vmem_to_hbm [thread:$0]  (%p1715_p11), %s856_s9, 256, %s858_s26, %s838_s16, %s1605_s30, %s1605_s30, %s1606_s14  }
 0x169   : > { %s1172_s20 = sshll.u32 %s2134_s8, 1  ;;  %s872_s19 = sshll.u32 %s1953_s23, 4  ;;  %s873_s19 = int_to_ptr.vmem [resolvable:$true] %s872_s19 }
 0x16a   : > { %s2137_s27 = sld [smem:[#allocation37_spill]]  ;;  %s843_s17 = scalar_lea.sflag [#allocation15], %s1882_s11 }
 0x170   : > { %s870_s28 = scalar_lea.hbm %s2137_s27, %s1172_s20  ;;  %s1520_s8 = scalar_lea.hbm %s2137_s27, 4 }
 0x171   : > { %s874_s21 = sshll.u32 %s870_s28, 4  ;;  %s875_s21 = int_to_ptr.hbm [resolvable:$true] %s874_s21 }
 0x172   : > { %s1514_s22 = sshra.s32 %s875_s21, 4  ;;  %s1515_s22 = int_to_ptr.hbm [resolvable:$true] %s1514_s22 }
 0x173   : > { %s1516_s12 = scalar_lea.hbm %s1515_s22, 2  ;;  %p1521_p13 = scmp.lt.s32.totalorder %s1515_s22, %s2137_s27 }
 0x174   : > { %p1517_p8 = scmp.ne.s32.totalorder %s1515_s22, %s1516_s12  ;;  %p1522_p6 = scmp.lt.s32.totalorder %s1520_s8, %s1516_s12 }
 0x176   : > { %p1518_p10 = pnand %p1517_p8, %p1715_p11  ;;  %p1523_p4 = por %p1522_p6, %p1521_p13 }
 0x178   : > { %p1519_p1 = pneg %p1518_p10 }
 0x17a   : > { %p1524_p2 = pnand %p1523_p4, %p1519_p1 }
 0x17c   : > { %1527 = shalt.err (!%p1524_p2)
}
 0x17d   : > { %1195 = dma.vmem_to_hbm [thread:$0]  (%p1715_p11), %s873_s19, 32, %s875_s21, %s843_s17  }
 0x17e PF: > { %s2138_s11 = sld [smem:[#allocation22_spill]] }
 0x17f   : > { %s2140_s16 = sld [smem:[#allocation24_spill]] }
 0x184   : > { %s886_s24 = sand.u32 1, %s2138_s11  }
 0x185   : > { %p2141_p9 = scmp.ge.s32.totalorder %s2140_s16, 2  ;;  %s887_s3 = scalar_lea.sflag [#allocation4], %s886_s24 }
 0x187   : > { %p1218_p3 = pnand %p2141_p9, %p1719_p12 }
 0x189   : > { %p1219_p0 = pneg %p1218_p3 }
 0x18b   : > { %1569 = dma.done.wait (%p1219_p0), %s887_s3, 256  }
 0x18c   : > { %1571 = vsyncadd (%p1219_p0), %s887_s3, 4294967040  ;;  %s897_s13 = scalar_lea.sflag [#allocation15], %s886_s24 }
 0x18d   : > { %1573 = dma.done.wait (%p1219_p0), %s897_s13, 32  }
 0x18e   : > { %1575 = vsyncadd (%p1219_p0), %s897_s13, 4294967264  ;;  %s2142_s20 = sld [smem:[#allocation26_spill]]  ;;  %s2145_s17 = smov %s1582_s18 }
 0x18f   : > { %s2143_s25 = sld [smem:[#allocation23_spill]] }
 0x190   : > { %s2144_s19 = sld [smem:[#allocation27_spill]] }
 0x194   : > { %p37_p11 = scmp.ge.s32.totalorder %s2142_s20, 4  }
 0x195   : > { %s2146_s18 = smov %s2143_s25 }
 0x196   :  { %39 = sbr.rel (!%p37_p11) target bundleno = 22 (0x16), region = 215 }
 0x19b   :  { %903 = vsyncpa [#allocation3], 1 }
 0x19c   :  { %905 = vsyncpa [#allocation3 + $0x1], 1 }
 0x19d   :  { %906 = vsyncpa [#allocation6], 1 }
 0x19e   :  { %908 = vsyncpa [#allocation6 + $0x1], 1 }
 0x19f   :  { %909 = vsyncpa [#allocation9], 1 }
 0x1a0   :  { %911 = vsyncpa [#allocation9 + $0x1], 1 }
 0x1a1   :  { %912 = vsyncpa [#allocation12], 1 }
 0x1a2   :  { %914 = vsyncpa [#allocation12 + $0x1], 1 }
 0x1a3   :  { %915 = vsyncpa [#allocation4], 1 }
 0x1a4   :  { %917 = vsyncpa [#allocation4 + $0x1], 1 }
 0x1a5   :  { %918 = vsyncpa [#allocation15], 1 }
 0x1a6   :  { %920 = vsyncpa [#allocation15 + $0x1], 1 }

</bundles_post_ra>
